<compile_context>
chip_gen: v7x
topology: tpu7x:2x2x1
jax: 0.10.0
libtpu: 0.0.40
codegen_flags: <defaults>
</compile_context>

<pallas_src>
import functools

import jax
import jax.numpy as jnp
from jax import lax
from jax.experimental import pallas as pl
from jax.experimental.pallas import tpu as pltpu


def _group_norm(x, gamma, beta, m_gc, mt_cg_scaled, eps=1e-5):
    """GroupNorm on a (C, HW_pad) f32 slab.

    gamma/beta: (C, 1).  m_gc: (G, C) 0/1 group membership.  mt_cg_scaled:
    (C, G) membership transpose with 1/(cpg*HW_valid) folded in.  Padded lanes
    of `x` must already be zero so they drop out of the statistics.
    """
    stats = jnp.concatenate(
        [jnp.sum(x, axis=1, keepdims=True),
         jnp.sum(x * x, axis=1, keepdims=True)], axis=1)                 # (C, 2)
    g_stats = jnp.dot(m_gc, stats, preferred_element_type=jnp.float32)   # (G, 2)
    b_stats = jnp.dot(mt_cg_scaled, g_stats,
                      preferred_element_type=jnp.float32)                # (C, 2) = [mean, E[x^2]]
    mean = b_stats[:, 0:1]
    var = b_stats[:, 1:2] - mean * mean
    return (x - mean) * (lax.rsqrt(var + eps) * gamma) + beta


def _cls_attn_kernel(G, nb, hw_valid,
                     x_ref, samp_ref, cw_ref, colp_ref, m_gc_ref, o_ref):
    C = x_ref.shape[1]
    hw_pad = x_ref.shape[2]

    # Shared (per-grid-step) parameters: one small fused column slab + the
    # (G, C) membership matrix + the 1x1 conv weight.
    cb = colp_ref[:, 0:1]              # (C, 1)  conv bias
    gn_w = colp_ref[:, 1:2]            # (C, 1)  out GroupNorm gamma
    gn_b = colp_ref[:, 2:3]            # (C, 1)  out GroupNorm beta
    mt_cg = colp_ref[:, 3:3 + G]       # (C, G)  membership^T with 1/(cpg*HW) folded in
    m_gc = m_gc_ref[...]               # (G, C)
    cw = cw_ref[...]                   # (C, C)  conv weight (bf16 or f32)

    need_mask = hw_valid != hw_pad     # static Python bool
    if need_mask:
        lane = lax.broadcasted_iota(jnp.int32, (C, hw_pad), 1)
        valid = lane < hw_valid        # hoisted out of the sample loop

    def body(i, carry):
        x = x_ref[i].astype(jnp.float32)              # (C, HW_pad); pads are 0

        # First GroupNorm.  The per-sample affine params already carry the
        # softmax-row-sum scale s (== 1 up to float noise), so this slab IS
        # x2 = GroupNorm_LN(x) * s with no extra elementwise work.
        sp = samp_ref[i]                               # (C, 2)
        x2 = _group_norm(x, sp[:, 0:1], sp[:, 1:2], m_gc, mt_cg)

        # out_emb: 1x1 conv = channel matmul (bf16 operands / f32 accum by
        # default) + bias.
        y = jnp.dot(cw, x2.astype(cw.dtype),
                    preferred_element_type=jnp.float32) + cb
        if need_mask:
            y = jnp.where(valid, y, 0.0)               # keep pads out of GN stats
        y = _group_norm(y, gn_w, gn_b, m_gc, mt_cg)

        # Residual: re-read the VMEM-resident input tile (vld slack) instead
        # of holding an extra f32 slab live across the whole body.
        o_ref[i] = (y + x_ref[i].astype(jnp.float32)).astype(o_ref.dtype)
        return carry

    # fori_loop (fully unrolled, static trip count) keeps per-sample
    # temporaries' live ranges bounded when nb > 1.
    lax.fori_loop(0, nb, body, 0, unroll=True)


def _vmem_capacity_bytes():
    try:
        info = pltpu.get_tpu_info()
        cap = int(getattr(info, "vmem_capacity_bytes", 0))
        if cap > 0:
            return cap
    except Exception:
        pass
    return 128 * 1024 * 1024   # v5e/v6e default; v7x reports 64 MiB when queryable


def _pick_nb(N, per_sample_bytes, target_bytes):
    """Largest nb that (a) divides N, (b) keeps the input block under the
    per-step byte target and (c) leaves >= 2 (preferably an even number of)
    grid steps so both v7x TensorCores get balanced work."""
    nb_cap = max(1, min(N, target_bytes // max(per_sample_bytes, 1)))
    divisors = [d for d in range(1, N + 1) if N % d == 0]
    cands = [d for d in divisors if d <= nb_cap] or [1]
    if N >= 2:
        two_step = [d for d in cands if N // d >= 2]
        if two_step:
            cands = two_step
    even = [d for d in cands if (N // d) % 2 == 0]
    pool = even if even else cands
    return max(pool)


def cls_attn_forward(x, cls, params, G, *, nb=None, conv_dtype=jnp.bfloat16):
    """clsAttn forward.

    x: (N, C, H, W), cls: (N, CLS).  params = (ln_w, ln_b, wq_t, bq, wk_t, bk,
    cw, cb, gn_w, gn_b): per-channel vectors (C, 1), linear weights transposed
    to (CLS, C), linear biases (1, C), 1x1-conv weight (C, C).  The output has
    x.dtype (bf16 in -> bf16 out halves HBM traffic; stats stay f32).
    """
    ln_w, ln_b, wq_t, bq, wk_t, bk, cw, cb, gn_w, gn_b = params
    N, C, H, W = x.shape
    assert C % G == 0
    cpg = C // G
    HW = H * W
    HW_pad = max(128, ((HW + 127) // 128) * 128)     # lane-dense loads/stores

    x_flat = x.reshape(N, C, HW)
    if HW_pad != HW:
        x_flat = jnp.pad(x_flat, ((0, 0), (0, 0), (0, HW_pad - HW)))

    # K/Q projection + softmax row-sum, computed exactly and cheaply here (XLA
    # fuses it down to an (N, C) result).  The module's einsum contracts the
    # softmax over its last axis, i.e. it scales channel c of GroupNorm_LN(X)
    # by s[n, c] = sum_d softmax(.)[n, c, d]  (== 1 up to float rounding).
    # Fold s into the first GroupNorm's affine params -> zero in-kernel cost.
    f32 = jnp.float32
    K = cls.astype(f32) @ wq_t.astype(f32) + bq.astype(f32)      # module: K = Q_emb(cls)
    Q = cls.astype(f32) @ wk_t.astype(f32) + bk.astype(f32)      # module: Q = K_emb(cls)
    logits = K[:, :, None] * Q[:, None, :] / jnp.sqrt(f32(C))
    s = jax.nn.softmax(logits, axis=-1).sum(-1)                  # (N, C) ~= 1
    samp = jnp.stack([ln_w.reshape(1, C).astype(f32) * s,
                      ln_b.reshape(1, C).astype(f32) * s],
                     axis=-1).astype(f32)                        # (N, C, 2)

    # 0/1 group membership; 1/(cpg*HW_valid) folded into the broadcast-back.
    grp = jnp.arange(C, dtype=jnp.int32) // cpg
    m_gc = (grp[None, :] == jnp.arange(G, dtype=jnp.int32)[:, None]
            ).astype(f32)                                        # (G, C)
    mt_cg_scaled = m_gc.T * (1.0 / float(cpg * HW))              # (C, G)

    colp = jnp.concatenate(
        [cb.reshape(C, 1), gn_w.reshape(C, 1), gn_b.reshape(C, 1), mt_cg_scaled],
        axis=1).astype(f32)                                      # (C, 3 + G)

    # Samples per grid step: large blocks amortize the ~0.35 us/step pipeline
    # overhead; targets ~8-16 MiB on 128 MiB VMEM parts (v5e/v6e) and ~4 MiB
    # on v7x (64 MiB), while keeping >= 2 (preferably even) grid steps.
    vmem_cap = _vmem_capacity_bytes()
    per_sample_in = C * HW_pad * x.dtype.itemsize
    if nb is None:
        target = min(16 << 20, max(2 << 20, vmem_cap // 16))
        nb = _pick_nb(N, per_sample_in, target)
    assert N % nb == 0, "nb must divide the batch size"
    # TODO(synk): a single sample whose C*HW working set exceeds VMEM would
    # need an HW tile axis with a two-pass GroupNorm; not implemented.

    block_bytes = nb * per_sample_in
    sample_f32 = C * HW_pad * 4
    vmem_limit = 4 * block_bytes + 6 * sample_f32 + (4 << 20)   # dbl-buffered in/out, temps, params
    vmem_limit = int(min(max(32 << 20, vmem_limit), (vmem_cap * 3) // 4))

    kernel = functools.partial(_cls_attn_kernel, G, nb, HW)

    out = pl.pallas_call(
        kernel,
        out_shape=jax.ShapeDtypeStruct((N, C, HW_pad), x.dtype),
        grid=(N // nb,),
        in_specs=[
            pl.BlockSpec((nb, C, HW_pad), lambda n: (n, 0, 0)),   # X block
            pl.BlockSpec((nb, C, 2), lambda n: (n, 0, 0)),        # per-sample GN1 affine (s folded)
            pl.BlockSpec((C, C), lambda n: (0, 0)),               # 1x1 conv weight
            pl.BlockSpec((C, 3 + G), lambda n: (0, 0)),           # fused column params
            pl.BlockSpec((G, C), lambda n: (0, 0)),               # group membership
        ],
        out_specs=pl.BlockSpec((nb, C, HW_pad), lambda n: (n, 0, 0)),
        compiler_params=pltpu.CompilerParams(
            dimension_semantics=("parallel",),
            vmem_limit_bytes=vmem_limit),
    )(x_flat, samp, cw.astype(conv_dtype), colp, m_gc)

    if HW_pad != HW:
        out = out[..., :HW]
    return out.reshape(N, C, H, W)


def ref_forward(x, cls, params, G):
    """Pure-JAX reference with the module's exact semantics."""
    ln_w, ln_b, wq_t, bq, wk_t, bk, cw, cb, gn_w, gn_b = params
    N, C, H, W = x.shape

    def gn(v, gamma, beta, eps=1e-5):
        vr = v.reshape(N, G, C // G, H, W)
        mean = vr.mean(axis=(2, 3, 4), keepdims=True)
        var = vr.var(axis=(2, 3, 4), keepdims=True)
        vn = ((vr - mean) / jnp.sqrt(var + eps)).reshape(N, C, H, W)
        return vn * gamma.reshape(1, C, 1, 1) + beta.reshape(1, C, 1, 1)

    res = x
    xn = gn(x, ln_w, ln_b)
    K = cls @ wq_t + bq                      # (N, C)
    Q = cls @ wk_t + bk                      # (N, C)
    KQ = jax.nn.softmax(K[:, :, None] * Q[:, None, :] / jnp.sqrt(jnp.float32(C)),
                        axis=-1)             # (N, C, C)
    x2 = xn * KQ.sum(-1)[:, :, None, None]   # einsum('nclw,ncd->nclw', xn, KQ)
    y = jnp.einsum('oi,nihw->nohw', cw, x2,
                   precision=jax.lax.Precision.HIGHEST) + cb.reshape(1, C, 1, 1)
    y = gn(y, gn_w, gn_b)
    return y + res


if __name__ == "__main__":
    # Small shapes consistent with the module: X is NCHW, cls is (N, cls_dim).
    N, C, H, W = 2, 8, 16, 16
    CLS = 32
    G = C // 4 if C > 4 else 1               # GroupNorm groups, as in __init__

    key = jax.random.PRNGKey(0)
    ks = jax.random.split(key, 13)
    x = jax.random.normal(ks[0], (N, C, H, W), dtype=jnp.float32)
    cls = jax.random.normal(ks[1], (N, CLS), dtype=jnp.float32)

    # Deterministic synthetic parameters (module's __init__ shapes).
    ln_w = 1.0 + 0.1 * jax.random.normal(ks[2], (C, 1), dtype=jnp.float32)
    ln_b = 0.1 * jax.random.normal(ks[3], (C, 1), dtype=jnp.float32)
    wq_t = 0.1 * jax.random.normal(ks[4], (CLS, C), dtype=jnp.float32)   # Linear(cls_dim, inCh).W^T
    bq = 0.1 * jax.random.normal(ks[5], (1, C), dtype=jnp.float32)
    wk_t = 0.1 * jax.random.normal(ks[6], (CLS, C), dtype=jnp.float32)
    bk = 0.1 * jax.random.normal(ks[7], (1, C), dtype=jnp.float32)
    cw = 0.1 * jax.random.normal(ks[8], (C, C), dtype=jnp.float32)       # Conv2d(inCh, inCh, 1) weight
    cb = 0.1 * jax.random.normal(ks[9], (C, 1), dtype=jnp.float32)
    gn_w = 1.0 + 0.1 * jax.random.normal(ks[10], (C, 1), dtype=jnp.float32)
    gn_b = 0.1 * jax.random.normal(ks[11], (C, 1), dtype=jnp.float32)
    params = (ln_w, ln_b, wq_t, bq, wk_t, bk, cw, cb, gn_w, gn_b)

    ref = ref_forward(x, cls, params, G)

    # Tolerances: 1e-2 for the f32 path (covers XLA's default bf16 matmul
    # passes on TPU when the kernel is evaluated in interpret mode), looser
    # for the bf16-operand / bf16-I/O fast paths.

    # 1) f32 conv path, default nb (grid of >= 2 parallel steps).
    out = jax.block_until_ready(
        cls_attn_forward(x, cls, params, G, conv_dtype=jnp.float32))
    assert out.shape == (N, C, H, W)
    assert jnp.allclose(out, ref, atol=1e-2, rtol=1e-2), "mismatch (f32 conv)"

    # 2) Default fast path: bf16 MXU operands for the 1x1 conv, f32 accum.
    out_bf = jax.block_until_ready(cls_attn_forward(x, cls, params, G))
    assert jnp.allclose(out_bf, ref, atol=2e-2, rtol=2e-2), "mismatch (bf16 conv)"

    # 3) Multiple samples per grid step (amortizes per-step overhead).
    out2 = jax.block_until_ready(
        cls_attn_forward(x, cls, params, G, nb=2, conv_dtype=jnp.float32))
    assert jnp.allclose(out2, ref, atol=1e-2, rtol=1e-2), "mismatch (nb=2)"

    # 4) Non-multiple-of-128 spatial size: lane padding + masked GN stats.
    x_odd = jax.random.normal(ks[12], (N, C, 6, 6), dtype=jnp.float32)
    out3 = jax.block_until_ready(
        cls_attn_forward(x_odd, cls, params, G, conv_dtype=jnp.float32))
    ref3 = ref_forward(x_odd, cls, params, G)
    assert jnp.allclose(out3, ref3, atol=1e-2, rtol=1e-2), "mismatch (padded HW)"

    # 5) bf16 activations in / bf16 out (halves HBM traffic on this
    #    bandwidth-bound kernel); internal statistics stay f32.
    x_bf = x.astype(jnp.bfloat16)
    out4 = jax.block_until_ready(cls_attn_forward(x_bf, cls, params, G))
    ref4 = ref_forward(x_bf.astype(jnp.float32), cls, params, G)
    assert out4.dtype == jnp.bfloat16
    assert jnp.allclose(out4.astype(jnp.float32), ref4, atol=3e-2, rtol=3e-2), \
        "mismatch (bf16 io)"

    print("KERNEL_OK")
</pallas_src>

<mosaic_0001>
module attributes {stable_mosaic.version = 11 : i64} {
  func.func @_cls_attn_kernel(%arg0: i32, %arg1: memref<1x8x256xf32, #tpu.memory_space<vmem>>, %arg2: memref<1x8x2xf32, #tpu.memory_space<vmem>>, %arg3: memref<8x8xf32, #tpu.memory_space<vmem>>, %arg4: memref<8x5xf32, #tpu.memory_space<vmem>>, %arg5: memref<2x8xf32, #tpu.memory_space<vmem>>, %arg6: memref<1x8x256xf32, #tpu.memory_space<vmem>>) attributes {dimension_semantics = [#tpu.dimension_semantics<parallel>], iteration_bounds = array<i64: 2>, scalar_prefetch = 0 : i64, scratch_operands = 0 : i64, tpu.core_type = #tpu.core_type<tc>, window_params = [{transform_indices = @transform_0, window_bounds = array<i64: 1, 8, 256>}, {transform_indices = @transform_1, window_bounds = array<i64: 1, 8, 2>}, {pipeline_mode = #tpu.pipeline_mode<synchronous>, transform_indices = @transform_2, window_bounds = array<i64: 8, 8>}, {pipeline_mode = #tpu.pipeline_mode<synchronous>, transform_indices = @transform_3, window_bounds = array<i64: 8, 5>}, {pipeline_mode = #tpu.pipeline_mode<synchronous>, transform_indices = @transform_4, window_bounds = array<i64: 2, 8>}, {transform_indices = @transform_5, window_bounds = array<i64: 1, 8, 256>}]} {
    %c0 = arith.constant 0 : index
    %c0_0 = arith.constant 0 : index
    %0 = vector.load %arg4[%c0, %c0_0] : memref<8x5xf32, #tpu.memory_space<vmem>>, vector<8x1xf32>
    %c0_1 = arith.constant 0 : index
    %c1 = arith.constant 1 : index
    %1 = vector.load %arg4[%c0_1, %c1] : memref<8x5xf32, #tpu.memory_space<vmem>>, vector<8x1xf32>
    %c0_2 = arith.constant 0 : index
    %c2 = arith.constant 2 : index
    %2 = vector.load %arg4[%c0_2, %c2] : memref<8x5xf32, #tpu.memory_space<vmem>>, vector<8x1xf32>
    %c0_3 = arith.constant 0 : index
    %c3 = arith.constant 3 : index
    %3 = vector.load %arg4[%c0_3, %c3] : memref<8x5xf32, #tpu.memory_space<vmem>>, vector<8x2xf32>
    %c0_4 = arith.constant 0 : index
    %c0_5 = arith.constant 0 : index
    %4 = vector.load %arg5[%c0_4, %c0_5] : memref<2x8xf32, #tpu.memory_space<vmem>>, vector<2x8xf32>
    %c0_6 = arith.constant 0 : index
    %c0_7 = arith.constant 0 : index
    %5 = vector.load %arg3[%c0_6, %c0_7] : memref<8x8xf32, #tpu.memory_space<vmem>>, vector<8x8xf32>
    %c0_i32 = arith.constant 0 : i32
    %6 = arith.index_cast %c0_i32 : i32 to index
    %c0_8 = arith.constant 0 : index
    %c0_9 = arith.constant 0 : index
    %7 = vector.load %arg1[%6, %c0_8, %c0_9] : memref<1x8x256xf32, #tpu.memory_space<vmem>>, vector<1x8x256xf32>
    %8 = vector.shape_cast %7 : vector<1x8x256xf32> to vector<8x256xf32>
    %9 = arith.index_cast %c0_i32 : i32 to index
    %c0_10 = arith.constant 0 : index
    %c0_11 = arith.constant 0 : index
    %10 = vector.load %arg2[%9, %c0_10, %c0_11] : memref<1x8x2xf32, #tpu.memory_space<vmem>>, vector<1x8x2xf32>
    %11 = vector.shape_cast %10 : vector<1x8x2xf32> to vector<8x2xf32>
    %12 = vector.extract_strided_slice %11 {offsets = [0, 0], sizes = [8, 1], strides = [1, 1]} : vector<8x2xf32> to vector<8x1xf32>
    %13 = vector.extract_strided_slice %11 {offsets = [0, 1], sizes = [8, 1], strides = [1, 1]} : vector<8x2xf32> to vector<8x1xf32>
    %cst = arith.constant dense<0.000000e+00> : vector<8xf32>
    %14 = vector.multi_reduction <add>, %8, %cst [1] : vector<8x256xf32> to vector<8xf32>
    %15 = vector.shape_cast %14 : vector<8xf32> to vector<8x1xf32>
    %16 = arith.mulf %8, %8 : vector<8x256xf32>
    %cst_12 = arith.constant dense<0.000000e+00> : vector<8xf32>
    %17 = vector.multi_reduction <add>, %16, %cst_12 [1] : vector<8x256xf32> to vector<8xf32>
    %18 = vector.shape_cast %17 : vector<8xf32> to vector<8x1xf32>
    %19 = tpu.concatenate %15, %18 in 1 : vector<8x1xf32>, vector<8x1xf32> -> vector<8x2xf32>
    %cst_13 = arith.constant dense<0.000000e+00> : vector<2x2xf32>
    %20 = tpu.matmul %4, %19, %cst_13 {dimension_numbers = #tpu.dot_dimension_numbers<[1], [0], [0], [1], [0, 0, 1, 1], [], []>} : vector<2x8xf32>, vector<8x2xf32>, vector<2x2xf32> -> vector<2x2xf32>
    %cst_14 = arith.constant dense<0.000000e+00> : vector<8x2xf32>
    %21 = tpu.matmul %3, %20, %cst_14 {dimension_numbers = #tpu.dot_dimension_numbers<[1], [0], [0], [1], [0, 0, 1, 1], [], []>} : vector<8x2xf32>, vector<2x2xf32>, vector<8x2xf32> -> vector<8x2xf32>
    %22 = vector.extract_strided_slice %21 {offsets = [0, 0], sizes = [8, 1], strides = [1, 1]} : vector<8x2xf32> to vector<8x1xf32>
    %23 = vector.extract_strided_slice %21 {offsets = [0, 1], sizes = [8, 1], strides = [1, 1]} : vector<8x2xf32> to vector<8x1xf32>
    %24 = arith.mulf %22, %22 : vector<8x1xf32>
    %25 = arith.subf %23, %24 : vector<8x1xf32>
    %26 = vector.broadcast %22 : vector<8x1xf32> to vector<8x256xf32>
    %27 = arith.subf %8, %26 : vector<8x256xf32>
    %cst_15 = arith.constant 9.99999974E-6 : f32
    %28 = vector.broadcast %cst_15 : f32 to vector<8x1xf32>
    %29 = arith.addf %25, %28 : vector<8x1xf32>
    %30 = math.rsqrt %29 : vector<8x1xf32>
    %31 = arith.mulf %30, %12 : vector<8x1xf32>
    %32 = vector.broadcast %31 : vector<8x1xf32> to vector<8x256xf32>
    %33 = arith.mulf %27, %32 : vector<8x256xf32>
    %34 = vector.broadcast %13 : vector<8x1xf32> to vector<8x256xf32>
    %35 = arith.addf %33, %34 : vector<8x256xf32>
    %cst_16 = arith.constant dense<0.000000e+00> : vector<8x256xf32>
    %36 = tpu.matmul %5, %35, %cst_16 {dimension_numbers = #tpu.dot_dimension_numbers<[1], [0], [0], [1], [0, 0, 1, 1], [], []>} : vector<8x8xf32>, vector<8x256xf32>, vector<8x256xf32> -> vector<8x256xf32>
    %37 = vector.broadcast %0 : vector<8x1xf32> to vector<8x256xf32>
    %38 = arith.addf %36, %37 : vector<8x256xf32>
    %cst_17 = arith.constant dense<0.000000e+00> : vector<8xf32>
    %39 = vector.multi_reduction <add>, %38, %cst_17 [1] : vector<8x256xf32> to vector<8xf32>
    %40 = vector.shape_cast %39 : vector<8xf32> to vector<8x1xf32>
    %41 = arith.mulf %38, %38 : vector<8x256xf32>
    %cst_18 = arith.constant dense<0.000000e+00> : vector<8xf32>
    %42 = vector.multi_reduction <add>, %41, %cst_18 [1] : vector<8x256xf32> to vector<8xf32>
    %43 = vector.shape_cast %42 : vector<8xf32> to vector<8x1xf32>
    %44 = tpu.concatenate %40, %43 in 1 : vector<8x1xf32>, vector<8x1xf32> -> vector<8x2xf32>
    %cst_19 = arith.constant dense<0.000000e+00> : vector<2x2xf32>
    %45 = tpu.matmul %4, %44, %cst_19 {dimension_numbers = #tpu.dot_dimension_numbers<[1], [0], [0], [1], [0, 0, 1, 1], [], []>} : vector<2x8xf32>, vector<8x2xf32>, vector<2x2xf32> -> vector<2x2xf32>
    %cst_20 = arith.constant dense<0.000000e+00> : vector<8x2xf32>
    %46 = tpu.matmul %3, %45, %cst_20 {dimension_numbers = #tpu.dot_dimension_numbers<[1], [0], [0], [1], [0, 0, 1, 1], [], []>} : vector<8x2xf32>, vector<2x2xf32>, vector<8x2xf32> -> vector<8x2xf32>
    %47 = vector.extract_strided_slice %46 {offsets = [0, 0], sizes = [8, 1], strides = [1, 1]} : vector<8x2xf32> to vector<8x1xf32>
    %48 = vector.extract_strided_slice %46 {offsets = [0, 1], sizes = [8, 1], strides = [1, 1]} : vector<8x2xf32> to vector<8x1xf32>
    %49 = arith.mulf %47, %47 : vector<8x1xf32>
    %50 = arith.subf %48, %49 : vector<8x1xf32>
    %51 = vector.broadcast %47 : vector<8x1xf32> to vector<8x256xf32>
    %52 = arith.subf %38, %51 : vector<8x256xf32>
    %cst_21 = arith.constant 9.99999974E-6 : f32
    %53 = vector.broadcast %cst_21 : f32 to vector<8x1xf32>
    %54 = arith.addf %50, %53 : vector<8x1xf32>
    %55 = math.rsqrt %54 : vector<8x1xf32>
    %56 = arith.mulf %55, %1 : vector<8x1xf32>
    %57 = vector.broadcast %56 : vector<8x1xf32> to vector<8x256xf32>
    %58 = arith.mulf %52, %57 : vector<8x256xf32>
    %59 = vector.broadcast %2 : vector<8x1xf32> to vector<8x256xf32>
    %60 = arith.addf %58, %59 : vector<8x256xf32>
    %61 = arith.index_cast %c0_i32 : i32 to index
    %c0_22 = arith.constant 0 : index
    %c0_23 = arith.constant 0 : index
    %62 = vector.load %arg1[%61, %c0_22, %c0_23] : memref<1x8x256xf32, #tpu.memory_space<vmem>>, vector<1x8x256xf32>
    %63 = vector.shape_cast %62 : vector<1x8x256xf32> to vector<8x256xf32>
    %64 = arith.addf %60, %63 : vector<8x256xf32>
    %65 = arith.index_cast %c0_i32 : i32 to index
    %c0_24 = arith.constant 0 : index
    %c0_25 = arith.constant 0 : index
    %66 = vector.load %arg6[%65, %c0_24, %c0_25] : memref<1x8x256xf32, #tpu.memory_space<vmem>>, vector<1x8x256xf32>
    %67 = vector.shape_cast %66 : vector<1x8x256xf32> to vector<8x256xf32>
    %68 = vector.shape_cast %64 : vector<8x256xf32> to vector<1x8x256xf32>
    tpu.vector_store %arg6[%65, %c0_24, %c0_25], %68 {strides = array<i32>} : memref<1x8x256xf32, #tpu.memory_space<vmem>>, vector<1x8x256xf32>,
    %c1_i32 = arith.constant 1 : i32
    return
  }
  func.func @transform_0(%arg0: i32) -> (i32, i32, i32) {
    %c0_i32 = arith.constant 0 : i32
    %c0_i32_0 = arith.constant 0 : i32
    %c0_i32_1 = arith.constant 0 : i32
    return %arg0, %c0_i32, %c0_i32_0 : i32, i32, i32
  }
  func.func @transform_1(%arg0: i32) -> (i32, i32, i32) {
    %c0_i32 = arith.constant 0 : i32
    %c0_i32_0 = arith.constant 0 : i32
    %c0_i32_1 = arith.constant 0 : i32
    return %arg0, %c0_i32, %c0_i32_0 : i32, i32, i32
  }
  func.func @transform_2(%arg0: i32) -> (i32, i32) {
    %c0_i32 = arith.constant 0 : i32
    %c0_i32_0 = arith.constant 0 : i32
    %c0_i32_1 = arith.constant 0 : i32
    return %c0_i32, %c0_i32_0 : i32, i32
  }
  func.func @transform_3(%arg0: i32) -> (i32, i32) {
    %c0_i32 = arith.constant 0 : i32
    %c0_i32_0 = arith.constant 0 : i32
    %c0_i32_1 = arith.constant 0 : i32
    return %c0_i32, %c0_i32_0 : i32, i32
  }
  func.func @transform_4(%arg0: i32) -> (i32, i32) {
    %c0_i32 = arith.constant 0 : i32
    %c0_i32_0 = arith.constant 0 : i32
    %c0_i32_1 = arith.constant 0 : i32
    return %c0_i32, %c0_i32_0 : i32, i32
  }
  func.func @transform_5(%arg0: i32) -> (i32, i32, i32) {
    %c0_i32 = arith.constant 0 : i32
    %c0_i32_0 = arith.constant 0 : i32
    %c0_i32_1 = arith.constant 0 : i32
    return %arg0, %c0_i32, %c0_i32_0 : i32, i32, i32
  }
}

</mosaic_0001>

<bundles_post_ra>
// kernel: tpu_custom_call.1
= control target key start
LH: loop header
LB: loop body
LE: loop exit
PB: predicated region body
PF: predicated region fallthrough
CT: control target
= control target key end

     0   :  { %10 = vsyncpa [#allocation3], 0  ;;  %s1306_s0 = inlined_call_operand.hbm [shape: f32[2,8,256], index: 0, kind: input, shape index: {}]   ;;  %s1307_s1 = inlined_call_operand.vmem [shape: f32[2,8,2], index: 1, kind: input, shape index: {}]   ;;  %s1308_s2 = inlined_call_operand.vmem [shape: f32[8,8], index: 2, kind: input, shape index: {}]   ;;  %s1309_s3 = inlined_call_operand.vmem [shape: f32[8,5], index: 3, kind: input, shape index: {}]   ;;  %s1310_s4 = inlined_call_operand.vmem [shape: f32[2,8], index: 4, kind: input, shape index: {}]   ;;  %s1311_s5 = inlined_call_operand.hbm [shape: f32[2,8,256], index: 5, kind: output, shape index: {}]  }
   0x1   :  { %12 = vsyncpa [#allocation3 + $0x1], 0 }
   0x2   :  { %13 = vsyncpa [#allocation4], 0 }
   0x3   :  { %15 = vsyncpa [#allocation4 + $0x1], 0  ;;  %s1074_s18 = smov 0   ;;  %s1076_s19 = smov 0  }
   0x4   :  { %s1078_s20 = smov 0   ;;  %s1080_s21 = smov 0  }
   0x5 LB: > { %s1095_s22 = sadd.s32 4294967295, %s1033_s21   ;;  %s821_s23 = sadd.s32 4294967294, %s1033_s21   ;;  %s1033_s21 = sphi %s1080_s21, %s1326_s21   ;;  %s1029_s20 = sphi %s1078_s20, %s1325_s20   ;;  %s1025_s19 = sphi %s1076_s19, %s1324_s19   ;;  %s1021_s18 = sphi %s1074_s18, %s1323_s18  }
   0x6   : > { %s1099_s24 = sadd.s32 1, %s1033_s21   ;;  %s28_s25 = sadd.s32 1, %s1029_s20 }
   0x7   : > { %s25_s26 = ssub.s32 %s1033_s21, %s1099_s24  ;;  %p35_p0 = scmp.ne.s32.totalorder %s1029_s20, %s1025_s19 }
   0x8   : > { %p26_p1 = scmp.eq.s32.totalorder %s25_s26, 0  ;;  %p36_p2 = scmp.eq.s32.totalorder %s1033_s21, 0 }
   0x9   : > { %p41_p3 = scmp.ne.s32.totalorder %s1025_s19, %s1021_s18  ;;  %p42_p4 = scmp.eq.s32.totalorder %s1095_s22, 0 }
   0xa   : > { %s1111_s27 = scalar_select %p26_p1, %s1029_s20, %s28_s25  }
   0xb   : > { %p1113_p5 = por %p36_p2, %p35_p0  ;;  %p1117_p6 = por %p42_p4, %p41_p3 }
   0xc   : > { %p154_p7 = scmp.eq.s32.totalorder %s1095_s22, 1  ;;  %p160_p8 = scmp.eq.s32.totalorder %s821_s23, 1 }
   0xd   : > { %p885_p10 = scmp.lt.s32.totalorder %s1033_s21, 2  ;;  %s189_s7 = sand.u32 1, %s1029_s20  }
   0xe   : > { %p1124_p11 = por %p154_p7, %p35_p0  ;;  %p1128_p12 = por %p160_p8, %p41_p3 }
   0xf   : > { %s843_s8 = sshll.u32 %s1033_s21, 8  ;;  %s824_s9 = sshll.u32 %s189_s7, 4 }
  0x10   : > { %s1315_s30 = scalar_select %p1124_p11, 1, 0 }
  0x11   : > { %s1316_s6 = scalar_select %p1128_p12, 1, 0 }
  0x12   : > { %s1137_s12 = scalar_lea.hbm %s1306_s0, %s843_s8  ;;  %s193_s13 = scalar_lea.vmem [#allocation2], %s824_s9 }
  0x13   : > { %s201_s14 = sshll.u32 %s193_s13, 4  ;;  %p1141_p13 = pnand %p885_p10, %p1113_p5  ;;  %s1145_s14 = int_to_ptr.vmem [resolvable:$true] %s201_s14 }
  0x14   : > { %s190_s16 = scalar_lea.sflag [#allocation3], %s189_s7  ;;  %s937_s17 = scalar_lea.hbm %s1137_s12, 256 }
  0x15   : > { %p938_p2 = scmp.ne.s32.totalorder %s1137_s12, %s937_s17  ;;  %p939_p3 = pneg %p1141_p13 }
  0x16   : > { %s942_s26 = scalar_lea.hbm %s1306_s0, 512  ;;  %p943_p5 = scmp.lt.u32.totalorder %s1137_s12, %s1306_s0 }
  0x17   : > { %p940_p4 = pnand %p939_p3, %p938_p2  ;;  %p944_p8 = scmp.lt.u32.totalorder %s942_s26, %s937_s17 }
  0x18   : > { %p946_p9 = scmp.lt.u32.totalorder %s937_s17, %s1137_s12 }
  0x19   : > { %p941_p7 = pneg %p940_p4  ;;  %p945_p10 = por %p944_p8, %p943_p5 }
  0x1b   : > { %p947_p0 = por %p946_p9, %p945_p10 }
  0x1d   : > { %p948_p1 = pnand %p947_p0, %p941_p7 }
  0x1f   : > { %951 = shalt.err (!%p948_p1)
}
  0x20   : > { %s952_s7 = scalar_lea.vmem %s1145_s14, 256  ;;  %s1035_s9 = smov [#allocation2]  }
  0x21   : > { %p953_p2 = scmp.ne.s32.totalorder %s1145_s14, %s952_s7  ;;  %s957_s10 = sshll.u32 %s1035_s9, 4  ;;  %s958_s10 = int_to_ptr.vmem [resolvable:$false] %s957_s10 }
  0x22   : > { %s959_s11 = scalar_lea.vmem %s958_s10, 512  ;;  %p960_p11 = scmp.lt.s32.totalorder %s1145_s14, %s958_s10 }
  0x23   : > { %p955_p4 = pnand %p953_p2, %p939_p3  ;;  %p961_p5 = scmp.lt.s32.totalorder %s959_s11, %s952_s7 }
  0x25   : > { %p956_p12 = pneg %p955_p4  ;;  %p962_p8 = por %p961_p5, %p960_p11 }
  0x27   : > { %p963_p9 = pnand %p962_p8, %p956_p12 }
  0x29   : > { %966 = shalt.err (!%p963_p9)
}
  0x2a   : > { %880 = dma.hbm_to_vmem [thread:$0]  (!%p1141_p13), %s1137_s12, 256, %s1145_s14, %s190_s16  }
  0x2b   : > { %p1318_p0 = scmp.lt.s32.totalorder %s1033_s21, 3  ;;  %p1319_p1 = scmp.ge.s32.totalorder %s1033_s21, 1 }
  0x2d   : > { %p214_p3 = pnand %p1319_p1, %p1318_p0 }
  0x2e   : > { %s1179_s13 = sand.u32 (!%p214_p3), 1, %s1025_s19  }
  0x2f   : > { %217 = sbr.rel (%p214_p3) target bundleno = 1974 (0x7b6), region = 40  ;;  %s828_s17 = sshll.u32 (!%p214_p3), %s1179_s13, 4 }
  0x30   : > { %s220_s23 = scalar_lea.sflag (!%p214_p3), [#allocation3], %s1179_s13  ;;  %s223_s15 = scalar_lea.vmem (!%p214_p3), [#allocation2], %s828_s17 }
  0x36   : > { %1012 = dma.done.wait (%p1117_p6), %s220_s23, 256  }
  0x37   : > { %1014 = vsyncadd (%p1117_p6), %s220_s23, 4294967040  ;;  %v1189_v0 = vld [vmem:[%s223_s15] sm:$0xff]  ;;  %v1191_v1 = vld [vmem:[%s223_s15 + $0x8] sm:$0xff]  ;;  %v1036_v6 = vmov 0.0   ;;  %vm1037_vm0 = vmmov 0   ;;  %s1038_s14 = smov 125  }
  0x38   : > { %v264_v2 = vadd.f32 %v1191_v1, %v1189_v0  ;;  %v267_v3 = vmul.f32 %v1189_v0, %v1189_v0  ;;  %v268_v4 = vmul.f32 %v1191_v1, %v1191_v1  ;;  %853 = vmatprep.subr.mxu0 %v1036_v6  ;;  %858 = vmatprep.subr.mxu1 %v1036_v6  ;;  %v1208_v7 = vld [vmem:[%s1309_s3] sm:$0xff]  ;;  %vm272_vm1 = vcmask 7168   ;;  %p254_p6 = scmp.lt.s32.totalorder %s1095_s22, 1  ;;  %s1040_s10 = smov 1  }
  0x39   : > { %855 = vmatprep.mubr.msk.f32.mxu0 %vm1037_vm0, %v1036_v6  ;;  %860 = vmatprep.mubr.msk.f32.mxu1 %vm1037_vm0, %v1036_v6  ;;  %v1214_v10 = vld [vmem:[%s1310_s4] sm:$0x3]  ;;  %vm274_vm2 = vcmask 64512   ;;  %vm354_vm3 = vcmask 1041408   ;;  %vm351_vm4 = vcmask 15360   ;;  %v1039_v15 = vmov 0  }
  0x3a   : > { %265 = vadd.xlane.f32.xlu0 %v264_v2  ;;  %v269_v5 = vadd.f32 %v268_v4, %v267_v3  ;;  %349 = vrot.lane.b32.xlu1 %v1208_v7, %s1038_s14  ;;  %s255_s26 = scalar_select %p254_p6, %s1095_s22, 1  ;;  %v1041_v20 = vmov 1   ;;  %v260_v36 = vld [vmem:[%s1308_s2] sm:$0xff]  ;;  %v1042_v54 = vmov 2  }
  0x3b   : > { %926 = vset.pattern.permute.xlu1 %v1039_v15  ;;  %929 = vset.pattern.permute.xlu0 %v1039_v15  ;;  %s844_s15 = sshll.u32 %s1095_s22, 8  ;;  %s253_s29 = scalar_lea.vmem [#allocation5], %s828_s17 }
  0x3c   : > { %s830_s28 = sshll.u32 %s255_s26, 3  ;;  %s739_s12 = sshll.u32 %s253_s29, 4  ;;  %s1264_s12 = int_to_ptr.vmem [resolvable:$true] %s739_s12 }
  0x3d   : > { %s257_s9 = scalar_lea.vmem %s1307_s1, %s830_s28  ;;  %s1262_s25 = scalar_lea.hbm %s1311_s5, %s844_s15 }
  0x3e   : > { %270 = vadd.xlane.f32.xlu0 %v269_v5  ;;  %v263_v16 = vld [vmem:[%s257_s9] sm:$0xff]  ;;  %s725_s22 = scalar_lea.sflag [#allocation4], %s1179_s13  ;;  %s967_s17 = scalar_lea.vmem %s1264_s12, 256 }
  0x3f   : > { %p968_p11 = scmp.ne.s32.totalorder %s1264_s12, %s967_s17  ;;  %p1320_p12 = scmp.ne.s32.totalorder %s1315_s30, 0 }
  0x40   : > { %s1043_s26 = smov [#allocation5]  }
  0x41   : > { %p969_p13 = pnand %p968_p11, %p1320_p12  ;;  %s971_s28 = sshll.u32 %s1043_s26, 4  ;;  %s972_s28 = int_to_ptr.vmem [resolvable:$false] %s971_s28 }
  0x42   : > { %s973_s8 = scalar_lea.vmem %s972_s28, 512  ;;  %p974_p10 = scmp.lt.s32.totalorder %s1264_s12, %s972_s28 }
  0x43   : > { %p970_p7 = pneg %p969_p13  ;;  %p975_p2 = scmp.lt.s32.totalorder %s973_s8, %s967_s17 }
  0x45   : > { %p976_p4 = por %p975_p2, %p974_p10 }
  0x47   : > { %p977_p5 = pnand %p976_p4, %p970_p7 }
  0x54   : > { %444 = vrot.lane.b32.xlu0 %v263_v16, %s1040_s10 }
  0xac   : > { %v1220_v12 = vpop.permute.xlu1 %349 }
  0xc7   : > { %v266_v8 = vpop.xlane.xlu0 %265 }
  0xcb   : > { %v271_v9 = vpop.xlane.xlu0 %270 }
  0xcc   : > { %v273_v11 = vsel %vm272_vm1, %v266_v8, %v271_v9 }
  0xcd   : > { %854 = vmatpush3.msra.mxu0 %v273_v11 }
  0xce   : > { %856 = vmatmul.mubr.msk.f32.vlgmr.msra.gmra.mrb[0].mxu0 %vm274_vm2, %v1214_v10 }
  0xcf   : > { %532 = vmatprep.mubr.f32.mxu0 %v1036_v6  ;;  %v445_v24 = vpop.permute.xlu0 %444 }
 0x1a1   : > { %v344_v13 = vpop.f32.mrb[0].mxu0 }
 0x1a2   : > { %v857_v14 = vpop.f32.mrb[1].mxu0  ;;  %859 = vmatpush3.msk.msra.mxu1 %vm354_vm3, %v344_v13 }
 0x1a3   : > { %861 = vmatmul.mubr.msk.f32.vlgmr.msra.gmra.mrb[0].mxu1 %vm351_vm4, %v1220_v12  ;;  %863 = vmatprep.subr.mxu1 %v1036_v6 }
 0x1a4   : > { %865 = vmatprep.mubr.msk.f32.mxu1 %vm1037_vm0, %v1036_v6 }
 0x276   : > { %v424_v17 = vpop.f32.mrb[0].mxu1 }
 0x277   : > { %v428_v18 = vmul.f32 %v424_v17, %v424_v17  ;;  %v862_v19 = vpop.f32.mrb[1].mxu1 }
 0x279   : > { %430 = vrot.lane.b32.xlu1 %v428_v18, %s1040_s10 }
 0x27d   : > { %436 = vperm.xlu1 %926, %v424_v17  }
 0x281   : > { %927 = vset.pattern.permute.xlu1 %v1041_v20 }
 0x2eb   : > { %v431_v21 = vpop.permute.xlu1 %430 }
 0x2ec   : > { %v433_v22 = vsub.f32 %v424_v17, %v431_v21 }
 0x2ee   : > { %v441_v23 = vadd.f32 1e-05, %v433_v22 }
 0x2f0   : > { %933 = vrsqrt.f32 %v441_v23 }
 0x2fa   : > { %v934_v25 = vpop.eup %933 }
 0x2fb   : > { %v447_v26 = vmul.f32 %v934_v25, %v445_v24 }
 0x2fc   : > { %v437_v27 = vpop.permute.xlu1 %436 }
 0x2fd   : > { %450 = vperm.xlu1 %927, %v447_v26   ;;  %v439_v29 = vsub.f32 %v1189_v0, %v437_v27  ;;  %v440_v30 = vsub.f32 %v1191_v1, %v437_v27 }
 0x301   : > { %456 = vperm.xlu1 %927, %v263_v16  }
 0x305   : > { %928 = vset.pattern.permute.xlu1 %v1039_v15 }
 0x306   : > { %462 = vperm.xlu1 %928, %v1208_v7  }
 0x30a   : > { %930 = vset.pattern.permute.xlu1 %v1041_v20 }
 0x37c   : > { %v451_v28 = vpop.permute.xlu1 %450 }
 0x37d   : > { %v453_v31 = vmul.f32 %v451_v28, %v439_v29  ;;  %v454_v32 = vmul.f32 %v451_v28, %v440_v30 }
 0x380   : > { %v457_v33 = vpop.permute.xlu1 %456 }
 0x381   : > { %v459_v34 = vadd.f32 %v457_v33, %v453_v31  ;;  %v460_v35 = vadd.f32 %v457_v33, %v454_v32 }
 0x383   : > { %468 = vmatprep.subr.mxu0 %v460_v35 }
 0x384   : > { %469 = vmatpush1.msra.mxu0 %v459_v34 }
 0x385   : > { %834 = vmatmul.mubr.msk.f32.vlgmr.msra.gmra.mrb[2].mxu0 %vm274_vm2, %v260_v36  ;;  %868 = vmatprep.subr.mxu0 %v1036_v6  ;;  %v463_v37 = vpop.permute.xlu1 %462 }
 0x386   : > { %870 = vmatprep.mubr.msk.f32.mxu0 %vm1037_vm0, %v1036_v6 }
 0x458   : > { %v534_v38 = vpop.f32.mrb[2].mxu0 }
 0x459   : > { %v535_v39 = vadd.f32 %v534_v38, %v463_v37  ;;  %v536_v40 = vpop.f32.mrb[3].mxu0 }
 0x45a   : > { %v537_v41 = vadd.f32 %v536_v40, %v463_v37 }
 0x45b   : > { %v542_v42 = vmul.f32 %v535_v39, %v535_v39 }
 0x45c   : > { %v539_v43 = vadd.f32 %v537_v41, %v535_v39  ;;  %v543_v44 = vmul.f32 %v537_v41, %v537_v41 }
 0x45e   : > { %540 = vadd.xlane.f32.xlu1 %v539_v43  ;;  %v544_v45 = vadd.f32 %v543_v44, %v542_v42 }
 0x460   : > { %545 = vadd.xlane.f32.xlu0 %v544_v45 }
 0x4eb   : > { %v541_v46 = vpop.xlane.xlu1 %540 }
 0x4ed   : > { %v546_v47 = vpop.xlane.xlu0 %545 }
 0x4ee   : > { %v547_v48 = vsel %vm272_vm1, %v541_v46, %v546_v47 }
 0x4ef   : > { %864 = vmatpush3.msra.mxu1 %v547_v48 }
 0x4f0   : > { %866 = vmatmul.mubr.msk.f32.vlgmr.msra.gmra.mrb[2].mxu1 %vm274_vm2, %v1214_v10 }
 0x5c3   : > { %v614_v49 = vpop.f32.mrb[2].mxu1 }
 0x5c4   : > { %v867_v50 = vpop.f32.mrb[3].mxu1  ;;  %869 = vmatpush3.msk.msra.mxu0 %vm354_vm3, %v614_v49 }
 0x5c5   : > { %871 = vmatmul.mubr.msk.f32.vlgmr.msra.gmra.mrb[4].mxu0 %vm351_vm4, %v1220_v12 }
 0x698   : > { %v687_v51 = vpop.f32.mrb[4].mxu0 }
 0x699   : > { %v691_v52 = vmul.f32 %v687_v51, %v687_v51  ;;  %699 = vperm.xlu0 %929, %v687_v51   ;;  %v872_v53 = vpop.f32.mrb[5].mxu0 }
 0x69b   : > { %693 = vrot.lane.b32.xlu1 %v691_v52, %s1040_s10 }
 0x69d   : > { %932 = vset.pattern.permute.xlu0 %v1042_v54 }
 0x70d   : > { %v694_v55 = vpop.permute.xlu1 %693 }
 0x70e   : > { %v696_v56 = vsub.f32 %v687_v51, %v694_v55 }
 0x710   : > { %v704_v57 = vadd.f32 1e-05, %v696_v56 }
 0x712   : > { %935 = vrsqrt.f32 %v704_v57 }
 0x718   : > { %v700_v60 = vpop.permute.xlu0 %699 }
 0x719   : > { %v702_v62 = vsub.f32 %v535_v39, %v700_v60  ;;  %v703_v63 = vsub.f32 %v537_v41, %v700_v60 }
 0x71c   : > { %v936_v58 = vpop.eup %935 }
 0x71d   : > { %v706_v59 = vmul.f32 %v936_v58, %v1208_v7 }
 0x71f   : > { %709 = vperm.xlu1 %930, %v706_v59  }
 0x723   : > { %931 = vset.pattern.permute.xlu1 %v1042_v54 }
 0x724   : > { %715 = vperm.xlu1 %931, %v1208_v7  }
 0x79e   : > { %v710_v61 = vpop.permute.xlu1 %709 }
 0x79f   : > { %v712_v2 = vmul.f32 %v710_v61, %v702_v62  ;;  %v713_v3 = vmul.f32 %v710_v61, %v703_v63 }
 0x7a3   : > { %v716_v4 = vpop.permute.xlu1 %715 }
 0x7a4   : > { %v718_v5 = vadd.f32 %v716_v4, %v712_v2  ;;  %v719_v6 = vadd.f32 %v716_v4, %v713_v3 }
 0x7a6   : > { %v720_v8 = vadd.f32 %v718_v5, %v1189_v0  ;;  %v721_v9 = vadd.f32 %v719_v6, %v1191_v1 }
 0x7a8   : > { %722 = vst [vmem:[%s253_s29] sm:$0xff] %v720_v8  ;;  %723 = vst [vmem:[%s253_s29 + $0x8] sm:$0xff] %v721_v9 }
 0x7a9   : > { %980 = shalt.err (!%p977_p5)
}
 0x7aa   : > { %s981_s13 = scalar_lea.hbm %s1262_s25, 256  ;;  %s985_s10 = scalar_lea.hbm %s1311_s5, 512 }
 0x7ab   : > { %p982_p8 = scmp.ne.s32.totalorder %s1262_s25, %s981_s13  ;;  %p986_p1 = scmp.lt.u32.totalorder %s1262_s25, %s1311_s5 }
 0x7ac   : > { %p987_p3 = scmp.lt.u32.totalorder %s985_s10, %s981_s13  ;;  %p989_p11 = scmp.lt.u32.totalorder %s981_s13, %s1262_s25 }
 0x7ad   : > { %p983_p9 = pnand %p982_p8, %p1320_p12 }
 0x7ae   : > { %p988_p6 = por %p987_p3, %p986_p1 }
 0x7af   : > { %p984_p0 = pneg %p983_p9 }
 0x7b0   : > { %p990_p13 = por %p989_p11, %p988_p6 }
 0x7b2   : > { %p991_p7 = pnand %p990_p13, %p984_p0 }
 0x7b4   : > { %994 = shalt.err (!%p991_p7)
}
 0x7b5   : > { %875 = dma.vmem_to_hbm [thread:$0]  (%p1320_p12), %s1264_s12, 256, %s1262_s25, %s725_s22  }
 0x7b6 PF: > { %s751_s15 = sand.u32 1, %s1021_s18   ;;  %p1321_p10 = scmp.ne.s32.totalorder %s1316_s6, 0 }
 0x7b7   : > { %p1322_p2 = scmp.ge.s32.totalorder %s1033_s21, 2  ;;  %s752_s29 = scalar_lea.sflag [#allocation4], %s751_s15 }
 0x7b9   : > { %p882_p4 = pnand %p1322_p2, %p1321_p10 }
 0x7bb   : > { %1016 = dma.done.wait (!%p882_p4), %s752_s29, 256  }
 0x7bc   : > { %1018 = vsyncadd (!%p882_p4), %s752_s29, 4294967040  ;;  %p18_p5 = scmp.ge.s32.totalorder %s1099_s24, 4   ;;  %s1323_s18 = smov %s1025_s19 }
 0x7bd   : > { %s1324_s19 = smov %s1029_s20  ;;  %s1325_s20 = smov %s1111_s27 }
 0x7be   : > { %s1326_s21 = smov %s1099_s24  ;;  %20 = sbr.rel (!%p18_p5) target bundleno = 5 (0x5), region = 88 }
 0x7c5   :  { %757 = vsyncpa [#allocation3], 1 }
 0x7c6   :  { %759 = vsyncpa [#allocation3 + $0x1], 1 }
 0x7c7   :  { %760 = vsyncpa [#allocation4], 1 }
 0x7c8   :  { %762 = vsyncpa [#allocation4 + $0x1], 1 }

</bundles_post_ra>
